<compile_context>
chip_gen: v6e
topology: v6e:2x2x1
jax: 0.10.0
libtpu: 0.0.40
codegen_flags: <defaults>
</compile_context>

<pallas_src>
import jax
import jax.numpy as jnp
from jax.experimental import pallas as pl
from jax.experimental.pallas import tpu as pltpu

LANES = 128


# ----------------------------------------------------------------------------
# Config (matches the PyTorch module's expected config)
# ----------------------------------------------------------------------------
class Config:
    input_dim = 32
    hidden_dims = [64, 48]
    embedding_dims = [32, 24]
    out_dims = [16, 8]
    dropout = 0.1  # inference: identity


def _round_up(a, m):
    return (a + m - 1) // m * m


# ----------------------------------------------------------------------------
# Parameter init (deterministic, roughly PyTorch-like uniform 1/sqrt(fan_in))
# ----------------------------------------------------------------------------
def _init_linear(key, d_in, d_out, dtype=jnp.float32):
    kw, kb = jax.random.split(key)
    bound = 1.0 / jnp.sqrt(jnp.asarray(d_in, dtype))
    w = jax.random.uniform(kw, (d_in, d_out), dtype, -bound, bound)
    b = jax.random.uniform(kb, (1, d_out), dtype, -bound, bound)
    return w, b


def init_params(cfg, key):
    params = {"mlp": [], "embedders": [], "predictors": []}

    dims = [cfg.input_dim] + list(cfg.hidden_dims)
    for i in range(len(cfg.hidden_dims)):
        key, sub = jax.random.split(key)
        params["mlp"].append(_init_linear(sub, dims[i], dims[i + 1]))

    e_dims = [cfg.hidden_dims[-1]] + list(cfg.embedding_dims)
    for i in range(len(cfg.embedding_dims)):
        key, sub = jax.random.split(key)
        params["embedders"].append(_init_linear(sub, e_dims[i], e_dims[i + 1]))

    for i in range(len(cfg.out_dims)):
        key, sub = jax.random.split(key)
        params["predictors"].append(
            _init_linear(sub, cfg.embedding_dims[i], cfg.out_dims[i])
        )
    return params


# ----------------------------------------------------------------------------
# Pack all parameters into two slabs (done ONCE, outside the kernel)
#   pass 0 .. n_mlp-1      : backbone MLP layers           (out at cols [0:H_i])
#   pass n_mlp             : embedder 0                     (out at emb_off[0])
#   pass n_mlp+i (1<=i<H)  : fused [embedder_i | predictor_{i-1}]
#   pass n_mlp+H           : predictor_{H-1}
# Every hierarchy pass writes into disjoint lane ranges → output slab = sum.
# ----------------------------------------------------------------------------
def pack_params(cfg, params):
    n_mlp = len(cfg.hidden_dims)
    n_hier = len(cfg.out_dims)
    assert n_hier == len(cfg.embedding_dims)
    n_passes = n_mlp + n_hier + 1

    E, O = list(cfg.embedding_dims), list(cfg.out_dims)
    emb_off, pred_off, off = [], [], 0
    for d in E:
        emb_off.append(off); off += d
    for d in O:
        pred_off.append(off); off += d
    payload = off
    assert payload <= LANES, "output payload must fit in 128 lanes"
    assert max([cfg.input_dim] + list(cfg.hidden_dims) + E) <= LANES

    w_slab = jnp.zeros((n_passes, LANES, LANES), jnp.float32)
    b_slab = jnp.zeros((_round_up(n_passes, 8), LANES), jnp.float32)

    def put(ws, bs, li, w, b, row0, col0):
        d_in, d_out = w.shape
        ws = ws.at[li, row0:row0 + d_in, col0:col0 + d_out].set(w)
        bs = bs.at[li, col0:col0 + d_out].set(b.reshape(-1))
        return ws, bs

    # Backbone MLP: input at cols [0:d_in], output at cols [0:d_out].
    for li in range(n_mlp):
        w, b = params["mlp"][li]
        w_slab, b_slab = put(w_slab, b_slab, li, w, b, 0, 0)

    # Embedder 0: reads MLP output at cols [0:hidden_dims[-1]].
    w, b = params["embedders"][0]
    w_slab, b_slab = put(w_slab, b_slab, n_mlp, w, b, 0, emb_off[0])

    # Fused passes: embedder_i and predictor_{i-1} both read emb_{i-1}.
    for i in range(1, n_hier):
        li = n_mlp + i
        we, be = params["embedders"][i]
        wp, bp = params["predictors"][i - 1]
        w_slab, b_slab = put(w_slab, b_slab, li, we, be, emb_off[i - 1], emb_off[i])
        w_slab, b_slab = put(w_slab, b_slab, li, wp, bp, emb_off[i - 1], pred_off[i - 1])

    # Final predictor: reads emb_{last}.
    wp, bp = params["predictors"][n_hier - 1]
    w_slab, b_slab = put(w_slab, b_slab, n_mlp + n_hier, wp, bp,
                         emb_off[-1], pred_off[-1])

    layout = dict(n_mlp=n_mlp, n_hier=n_hier, n_passes=n_passes,
                  emb_off=emb_off, pred_off=pred_off)
    return w_slab.astype(jnp.bfloat16), b_slab, layout


# ----------------------------------------------------------------------------
# Fused forward: one pallas_call, batch-tiled grid, weights resident in VMEM
# ----------------------------------------------------------------------------
def build_forward(cfg, layout):
    n_mlp = layout["n_mlp"]
    n_passes = layout["n_passes"]
    d_in0 = cfg.input_dim

    def kernel(x_ref, w_ref, b_ref, out_ref):
        h = x_ref[...].astype(jnp.bfloat16)          # (B_t, d_in0)
        k = d_in0
        slab = None
        for li in range(n_passes):                   # statically unrolled
            w = w_ref[li, :k, :] if k < LANES else w_ref[li]   # bf16 (k,128)
            b = b_ref[li:li + 1, :]                            # f32  (1,128)
            y = jnp.dot(h, w, preferred_element_type=jnp.float32)
            y = jnp.maximum(y + b, 0.0)              # f32 epilogue (v5e-safe)
            if li >= n_mlp:                          # hierarchy passes write
                slab = y if slab is None else slab + y   # disjoint lane ranges
            h = y.astype(jnp.bfloat16)
            k = LANES
        out_ref[...] = slab.astype(out_ref.dtype)    # single unmasked store

    def forward(w_slab, b_slab, x):
        B = x.shape[0]
        B_t = min(512, _round_up(B, 8))              # MXU-filling, VMEM-safe tile
        Bp = _round_up(B, B_t)
        if Bp != B:
            x = jnp.pad(x, ((0, Bp - B), (0, 0)))
        grid = (Bp // B_t,)

        slab = pl.pallas_call(
            kernel,
            out_shape=jax.ShapeDtypeStruct((Bp, LANES), jnp.float32),
            grid_spec=pltpu.PrefetchScalarGridSpec(
                num_scalar_prefetch=0,
                grid=grid,
                in_specs=[
                    pl.BlockSpec((B_t, d_in0), lambda i: (i, 0)),
                    pl.BlockSpec((n_passes, LANES, LANES), lambda i: (0, 0, 0)),
                    pl.BlockSpec((b_slab.shape[0], LANES), lambda i: (0, 0)),
                ],
                out_specs=pl.BlockSpec((B_t, LANES), lambda i: (i, 0)),
            ),
            compiler_params=pltpu.CompilerParams(
                dimension_semantics=("parallel",)),
        )(x, w_slab, b_slab)

        slab = slab[:B]
        embeddings = [slab[:, o:o + d]
                      for o, d in zip(layout["emb_off"], cfg.embedding_dims)]
        predictions = [slab[:, o:o + d]
                       for o, d in zip(layout["pred_off"], cfg.out_dims)]
        return predictions, embeddings

    return jax.jit(forward)


# ----------------------------------------------------------------------------
# References for sanity checks
# ----------------------------------------------------------------------------
def _ref_forward_bf16(params, x):
    """Mirrors the kernel arithmetic: bf16 matmul operands, f32 acc/epilogue."""
    def lin(h, w, b):
        y = jnp.dot(h.astype(jnp.bfloat16), w.astype(jnp.bfloat16),
                    preferred_element_type=jnp.float32)
        return jnp.maximum(y + b, 0.0)
    h = x
    for (w, b) in params["mlp"]:
        h = lin(h, w, b)
    embeddings, predictions = [], []
    for (we, be), (wp, bp) in zip(params["embedders"], params["predictors"]):
        h = lin(h, we, be)
        predictions.append(lin(h, wp, bp))
        embeddings.append(h)
    return predictions, embeddings


def _ref_forward_f32(params, x):
    """Full-f32 reference (PyTorch-equivalent math, eval-mode dropout)."""
    def lin(h, w, b):
        return jnp.maximum(h @ w + b, 0.0)
    h = x
    for (w, b) in params["mlp"]:
        h = lin(h, w, b)
    embeddings, predictions = [], []
    for (we, be), (wp, bp) in zip(params["embedders"], params["predictors"]):
        h = lin(h, we, be)
        predictions.append(lin(h, wp, bp))
        embeddings.append(h)
    return predictions, embeddings


if __name__ == "__main__":
    cfg = Config()
    key = jax.random.PRNGKey(0)
    key_params, key_x = jax.random.split(key)

    params = init_params(cfg, key_params)
    w_slab, b_slab, layout = pack_params(cfg, params)

    batch = 8  # multiple of 8 (f32 sublane) — single aligned tile for the demo
    x = jax.random.normal(key_x, (batch, cfg.input_dim), dtype=jnp.float32)

    forward = build_forward(cfg, layout)
    predictions, embeddings = forward(w_slab, b_slab, x)
    jax.block_until_ready(predictions)
    jax.block_until_ready(embeddings)

    # Tight check vs a reference using identical arithmetic (bf16 MXU operands).
    rp, re = _ref_forward_bf16(params, x)
    for a, b_ in zip(predictions, rp):
        assert a.shape == b_.shape and jnp.allclose(a, b_, atol=1e-4, rtol=1e-4), \
            "prediction mismatch (bf16 ref)"
    for a, b_ in zip(embeddings, re):
        assert a.shape == b_.shape and jnp.allclose(a, b_, atol=1e-4, rtol=1e-4), \
            "embedding mismatch (bf16 ref)"

    # Loose check vs the full-f32 PyTorch-equivalent math (bf16 MXU rounding only).
    rp32, re32 = _ref_forward_f32(params, x)
    for a, b_ in zip(predictions, rp32):
        assert jnp.allclose(a, b_, atol=5e-2, rtol=5e-2), "prediction drift vs f32"
    for a, b_ in zip(embeddings, re32):
        assert jnp.allclose(a, b_, atol=5e-2, rtol=5e-2), "embedding drift vs f32"

    print("KERNEL_OK")
</pallas_src>

<mosaic_0001>
module attributes {stable_mosaic.version = 11 : i64} {
  func.func @kernel(%arg0: i32, %arg1: memref<8x32xf32, #tpu.memory_space<vmem>>, %arg2: memref<5x128x128xbf16, #tpu.memory_space<vmem>>, %arg3: memref<8x128xf32, #tpu.memory_space<vmem>>, %arg4: memref<8x128xf32, #tpu.memory_space<vmem>>) attributes {dimension_semantics = [#tpu.dimension_semantics<parallel>], iteration_bounds = array<i64: 1>, scalar_prefetch = 0 : i64, scratch_operands = 0 : i64, tpu.core_type = #tpu.core_type<tc>, window_params = [{transform_indices = @transform_0, window_bounds = array<i64: 8, 32>}, {pipeline_mode = #tpu.pipeline_mode<synchronous>, transform_indices = @transform_1, window_bounds = array<i64: 5, 128, 128>}, {pipeline_mode = #tpu.pipeline_mode<synchronous>, transform_indices = @transform_2, window_bounds = array<i64: 8, 128>}, {transform_indices = @transform_3, window_bounds = array<i64: 8, 128>}]} {
    %c0 = arith.constant 0 : index
    %c0_0 = arith.constant 0 : index
    %0 = vector.load %arg1[%c0, %c0_0] : memref<8x32xf32, #tpu.memory_space<vmem>>, vector<8x32xf32>
    %1 = arith.truncf %0 : vector<8x32xf32> to vector<8x32xbf16>
    %c0_1 = arith.constant 0 : index
    %c0_2 = arith.constant 0 : index
    %c0_3 = arith.constant 0 : index
    %2 = vector.load %arg2[%c0_1, %c0_2, %c0_3] : memref<5x128x128xbf16, #tpu.memory_space<vmem>>, vector<1x32x128xbf16>
    %3 = vector.shape_cast %2 : vector<1x32x128xbf16> to vector<32x128xbf16>
    %c0_4 = arith.constant 0 : index
    %c0_5 = arith.constant 0 : index
    %4 = vector.load %arg3[%c0_4, %c0_5] : memref<8x128xf32, #tpu.memory_space<vmem>>, vector<1x128xf32>
    %cst = arith.constant dense<0.000000e+00> : vector<8x128xf32>
    %5 = tpu.matmul %1, %3, %cst {dimension_numbers = #tpu.dot_dimension_numbers<[1], [0], [0], [1], [0, 0, 1, 1], [], []>} : vector<8x32xbf16>, vector<32x128xbf16>, vector<8x128xf32> -> vector<8x128xf32>
    %6 = vector.broadcast %4 : vector<1x128xf32> to vector<8x128xf32>
    %7 = arith.addf %5, %6 : vector<8x128xf32>
    %cst_6 = arith.constant 0.000000e+00 : f32
    %8 = vector.broadcast %cst_6 : f32 to vector<8x128xf32>
    %9 = arith.maximumf %7, %8 : vector<8x128xf32>
    %10 = arith.truncf %9 : vector<8x128xf32> to vector<8x128xbf16>
    %c1 = arith.constant 1 : index
    %c0_7 = arith.constant 0 : index
    %c0_8 = arith.constant 0 : index
    %11 = vector.load %arg2[%c1, %c0_7, %c0_8] : memref<5x128x128xbf16, #tpu.memory_space<vmem>>, vector<1x128x128xbf16>
    %12 = vector.shape_cast %11 : vector<1x128x128xbf16> to vector<128x128xbf16>
    %c1_9 = arith.constant 1 : index
    %c0_10 = arith.constant 0 : index
    %13 = vector.load %arg3[%c1_9, %c0_10] : memref<8x128xf32, #tpu.memory_space<vmem>>, vector<1x128xf32>
    %cst_11 = arith.constant dense<0.000000e+00> : vector<8x128xf32>
    %14 = tpu.matmul %10, %12, %cst_11 {dimension_numbers = #tpu.dot_dimension_numbers<[1], [0], [0], [1], [0, 0, 1, 1], [], []>} : vector<8x128xbf16>, vector<128x128xbf16>, vector<8x128xf32> -> vector<8x128xf32>
    %15 = vector.broadcast %13 : vector<1x128xf32> to vector<8x128xf32>
    %16 = arith.addf %14, %15 : vector<8x128xf32>
    %cst_12 = arith.constant 0.000000e+00 : f32
    %17 = vector.broadcast %cst_12 : f32 to vector<8x128xf32>
    %18 = arith.maximumf %16, %17 : vector<8x128xf32>
    %19 = arith.truncf %18 : vector<8x128xf32> to vector<8x128xbf16>
    %c2 = arith.constant 2 : index
    %c0_13 = arith.constant 0 : index
    %c0_14 = arith.constant 0 : index
    %20 = vector.load %arg2[%c2, %c0_13, %c0_14] : memref<5x128x128xbf16, #tpu.memory_space<vmem>>, vector<1x128x128xbf16>
    %21 = vector.shape_cast %20 : vector<1x128x128xbf16> to vector<128x128xbf16>
    %c2_15 = arith.constant 2 : index
    %c0_16 = arith.constant 0 : index
    %22 = vector.load %arg3[%c2_15, %c0_16] : memref<8x128xf32, #tpu.memory_space<vmem>>, vector<1x128xf32>
    %cst_17 = arith.constant dense<0.000000e+00> : vector<8x128xf32>
    %23 = tpu.matmul %19, %21, %cst_17 {dimension_numbers = #tpu.dot_dimension_numbers<[1], [0], [0], [1], [0, 0, 1, 1], [], []>} : vector<8x128xbf16>, vector<128x128xbf16>, vector<8x128xf32> -> vector<8x128xf32>
    %24 = vector.broadcast %22 : vector<1x128xf32> to vector<8x128xf32>
    %25 = arith.addf %23, %24 : vector<8x128xf32>
    %cst_18 = arith.constant 0.000000e+00 : f32
    %26 = vector.broadcast %cst_18 : f32 to vector<8x128xf32>
    %27 = arith.maximumf %25, %26 : vector<8x128xf32>
    %28 = arith.truncf %27 : vector<8x128xf32> to vector<8x128xbf16>
    %c3 = arith.constant 3 : index
    %c0_19 = arith.constant 0 : index
    %c0_20 = arith.constant 0 : index
    %29 = vector.load %arg2[%c3, %c0_19, %c0_20] : memref<5x128x128xbf16, #tpu.memory_space<vmem>>, vector<1x128x128xbf16>
    %30 = vector.shape_cast %29 : vector<1x128x128xbf16> to vector<128x128xbf16>
    %c3_21 = arith.constant 3 : index
    %c0_22 = arith.constant 0 : index
    %31 = vector.load %arg3[%c3_21, %c0_22] : memref<8x128xf32, #tpu.memory_space<vmem>>, vector<1x128xf32>
    %cst_23 = arith.constant dense<0.000000e+00> : vector<8x128xf32>
    %32 = tpu.matmul %28, %30, %cst_23 {dimension_numbers = #tpu.dot_dimension_numbers<[1], [0], [0], [1], [0, 0, 1, 1], [], []>} : vector<8x128xbf16>, vector<128x128xbf16>, vector<8x128xf32> -> vector<8x128xf32>
    %33 = vector.broadcast %31 : vector<1x128xf32> to vector<8x128xf32>
    %34 = arith.addf %32, %33 : vector<8x128xf32>
    %cst_24 = arith.constant 0.000000e+00 : f32
    %35 = vector.broadcast %cst_24 : f32 to vector<8x128xf32>
    %36 = arith.maximumf %34, %35 : vector<8x128xf32>
    %37 = arith.addf %27, %36 : vector<8x128xf32>
    %38 = arith.truncf %36 : vector<8x128xf32> to vector<8x128xbf16>
    %c4 = arith.constant 4 : index
    %c0_25 = arith.constant 0 : index
    %c0_26 = arith.constant 0 : index
    %39 = vector.load %arg2[%c4, %c0_25, %c0_26] : memref<5x128x128xbf16, #tpu.memory_space<vmem>>, vector<1x128x128xbf16>
    %40 = vector.shape_cast %39 : vector<1x128x128xbf16> to vector<128x128xbf16>
    %c4_27 = arith.constant 4 : index
    %c0_28 = arith.constant 0 : index
    %41 = vector.load %arg3[%c4_27, %c0_28] : memref<8x128xf32, #tpu.memory_space<vmem>>, vector<1x128xf32>
    %cst_29 = arith.constant dense<0.000000e+00> : vector<8x128xf32>
    %42 = tpu.matmul %38, %40, %cst_29 {dimension_numbers = #tpu.dot_dimension_numbers<[1], [0], [0], [1], [0, 0, 1, 1], [], []>} : vector<8x128xbf16>, vector<128x128xbf16>, vector<8x128xf32> -> vector<8x128xf32>
    %43 = vector.broadcast %41 : vector<1x128xf32> to vector<8x128xf32>
    %44 = arith.addf %42, %43 : vector<8x128xf32>
    %cst_30 = arith.constant 0.000000e+00 : f32
    %45 = vector.broadcast %cst_30 : f32 to vector<8x128xf32>
    %46 = arith.maximumf %44, %45 : vector<8x128xf32>
    %47 = arith.addf %37, %46 : vector<8x128xf32>
    %c0_31 = arith.constant 0 : index
    %c0_32 = arith.constant 0 : index
    %48 = vector.load %arg4[%c0_31, %c0_32] : memref<8x128xf32, #tpu.memory_space<vmem>>, vector<8x128xf32>
    tpu.vector_store %arg4[%c0_31, %c0_32], %47 {strides = array<i32>} : memref<8x128xf32, #tpu.memory_space<vmem>>, vector<8x128xf32>,
    return
  }
  func.func @transform_0(%arg0: i32) -> (i32, i32) {
    %c0_i32 = arith.constant 0 : i32
    %c0_i32_0 = arith.constant 0 : i32
    return %arg0, %c0_i32 : i32, i32
  }
  func.func @transform_1(%arg0: i32) -> (i32, i32, i32) {
    %c0_i32 = arith.constant 0 : i32
    %c0_i32_0 = arith.constant 0 : i32
    %c0_i32_1 = arith.constant 0 : i32
    %c0_i32_2 = arith.constant 0 : i32
    return %c0_i32, %c0_i32_0, %c0_i32_1 : i32, i32, i32
  }
  func.func @transform_2(%arg0: i32) -> (i32, i32) {
    %c0_i32 = arith.constant 0 : i32
    %c0_i32_0 = arith.constant 0 : i32
    %c0_i32_1 = arith.constant 0 : i32
    return %c0_i32, %c0_i32_0 : i32, i32
  }
  func.func @transform_3(%arg0: i32) -> (i32, i32) {
    %c0_i32 = arith.constant 0 : i32
    %c0_i32_0 = arith.constant 0 : i32
    return %arg0, %c0_i32 : i32, i32
  }
}

</mosaic_0001>

<bundles_post_ra>
// kernel: forward.1
= control target key start
LH: loop header
LB: loop body
LE: loop exit
PB: predicated region body
PF: predicated region fallthrough
CT: control target
= control target key end

     0   :  { %8 = vsyncpa [#allocation3], 0  ;;  %s932_s0 = inlined_call_operand.hbm [shape: f32[8,32], index: 0, kind: input, shape index: {}]   ;;  %s933_s1 = inlined_call_operand.hbm [shape: bf16[5,128,128], index: 1, kind: input, shape index: {}]   ;;  %s934_s2 = inlined_call_operand.hbm [shape: f32[8,128], index: 2, kind: input, shape index: {}]   ;;  %s935_s3 = inlined_call_operand.vmem [shape: f32[8,128], index: 3, kind: output, shape index: {}]  }
   0x1   :  { %9 = vsyncpa [#allocation5], 0  ;;  %s849_s12 = smov [#allocation4]  }
   0x2   :  { %s25_s13 = sshll.u32 %s849_s12, 4  ;;  %s26_s13 = int_to_ptr.vmem [resolvable:$true] %s25_s13 }
   0x3   :  { %s793_s14 = scalar_lea.vmem %s26_s13, 5120  ;;  %p798_p1 = scmp.lt.s32.totalorder %s26_s13, %s26_s13 }
   0x4   :  { %p794_p0 = scmp.ne.s32.totalorder %s26_s13, %s793_s14  ;;  %p799_p2 = scmp.lt.s32.totalorder %s793_s14, %s793_s14 }
   0x6   :  { %p800_p3 = por %p799_p2, %p798_p1 }
   0x8   :  { %p801_p4 = pnand %p800_p3, %p794_p0 }
   0xa   :  { %804 = shalt.err (!%p801_p4)
}
   0xb   :  { %s850_s15 = smov 64   ;;  %s851_s16 = smov 4  }
   0xc   :  { %31 = dma.hbm_to_vmem [thread:$0]  %s933_s1, 5120, %s26_s13, [#allocation5], %s850_s15, %s850_s15, %s851_s16  }
   0xd   :  { %s852_s19 = smov [#allocation2]   ;;  %s853_s21 = smov [#allocation6]  }
   0xe   :  { %s16_s20 = sshll.u32 %s852_s19, 4  ;;  %s38_s22 = sshll.u32 %s853_s21, 4  ;;  %s17_s20 = int_to_ptr.vmem [resolvable:$true] %s16_s20  ;;  %s39_s22 = int_to_ptr.vmem [resolvable:$true] %s38_s22 }
   0xf   :  { %s813_s23 = scalar_lea.vmem %s17_s20, 128  ;;  %p818_p6 = scmp.lt.s32.totalorder %s17_s20, %s17_s20 }
  0x10   :  { %p814_p5 = scmp.ne.s32.totalorder %s17_s20, %s813_s23  ;;  %p819_p7 = scmp.lt.s32.totalorder %s813_s23, %s813_s23 }
  0x12   :  { %p820_p8 = por %p819_p7, %p818_p6 }
  0x14   :  { %p821_p9 = pnand %p820_p8, %p814_p5 }
  0x16   :  { %824 = shalt.err (!%p821_p9)
}
  0x17   :  { %19 = dma.hbm_to_vmem [thread:$0]  %s932_s0, 128, %s17_s20, [#allocation3]  }
  0x18   :  { %s833_s26 = scalar_lea.vmem %s39_s22, 128  ;;  %p838_p11 = scmp.lt.s32.totalorder %s39_s22, %s39_s22 }
  0x19   :  { %p834_p10 = scmp.ne.s32.totalorder %s39_s22, %s833_s26  ;;  %p839_p12 = scmp.lt.s32.totalorder %s833_s26, %s833_s26 }
  0x1b   :  { %p840_p13 = por %p839_p12, %p838_p11 }
  0x1d   :  { %p841_p0 = pnand %p840_p13, %p834_p10 }
  0x1f   :  { %844 = shalt.err (!%p841_p0)
}
  0x20   :  { %41 = dma.hbm_to_vmem [thread:$0]  %s934_s2, 128, %s39_s22, [#allocation5]  }
  0x21   :  { %845 = dma.done.wait [#allocation3], 128  }
  0x22   :  { %846 = vsyncadd [#allocation3], 4294967168 }
  0x23   :  { %847 = dma.done.wait [#allocation5], 5248  }
  0x24   :  { %848 = vsyncadd [#allocation5], 4294962048  ;;  %v854_v0 = vmov 0.0   ;;  %vm855_vm0 = vmmov 0   ;;  %v751_v1 = vld [vmem:[#allocation4 + $0x8] sm:$0xff]   ;;  %v752_v2 = vld [vmem:[#allocation4] sm:$0xff]  }
  0x25   :  { %656 = vmatprep.subr.bf16.mxu0 %v854_v0  ;;  %660 = vmatprep.mubr.msk.bf16.mxu0 %vm855_vm0, %v854_v0  ;;  %v52_v3 = vld [vmem:[#allocation2] sm:$0xff]  ;;  %v754_v6 = vld [vmem:[#allocation4 + $0x70] sm:$0xff]   ;;  %vm75_vm1 = vcmask 261120   ;;  %v755_v7 = vld [vmem:[#allocation4 + $0x68] sm:$0xff]  }
  0x26   :  { %664 = vmatprep.subr.bf16.mxu1 %v854_v0  ;;  %680 = vmatprep.mubr.msk.bf16.mxu1 %vm855_vm0, %v854_v0  ;;  %v753_v4 = vld [vmem:[#allocation4 + $0x78] sm:$0xff]   ;;  %v53_v5 = vpack.c.bf16 %v52_v3, %v52_v3  ;;  %v756_v8 = vld [vmem:[#allocation4 + $0x60] sm:$0xff]   ;;  %v758_v10 = vld [vmem:[#allocation4 + $0x50] sm:$0xff]  }
  0x27   :  { %657 = vmatpush3.bf16.msra.mxu0 %v751_v1  ;;  %665 = vmatpush3.bf16.msra.mxu1 %v753_v4  ;;  %v757_v9 = vld [vmem:[#allocation4 + $0x58] sm:$0xff]   ;;  %v759_v11 = vld [vmem:[#allocation4 + $0x48] sm:$0xff]   ;;  %v760_v12 = vld [vmem:[#allocation4 + $0x40] sm:$0xff]  }
  0x28   :  { %658 = vmatprep.subr.bf16.mxu0 %v854_v0  ;;  %666 = vmatprep.subr.bf16.mxu1 %v854_v0  ;;  %v761_v13 = vld [vmem:[#allocation4 + $0xb8] sm:$0xff]   ;;  %v762_v14 = vld [vmem:[#allocation4 + $0xb0] sm:$0xff]   ;;  %v763_v15 = vld [vmem:[#allocation4 + $0xa8] sm:$0xff]  }
  0x29   :  { %v764_v16 = vld [vmem:[#allocation4 + $0xa0] sm:$0xff]   ;;  %v765_v17 = vld [vmem:[#allocation4 + $0x98] sm:$0xff]   ;;  %v766_v18 = vld [vmem:[#allocation4 + $0x90] sm:$0xff]  }
  0x2a   :  { %v577_v19 = vld [vmem:[#allocation6] ss:$0 sm:$0xff]  ;;  %v767_v27 = vld [vmem:[#allocation4 + $0x88] sm:$0xff]   ;;  %v769_v29 = vld [vmem:[#allocation4 + $0xf8] sm:$0xff]  }
  0x2b   :  { %659 = vmatpush3.bf16.msra.mxu0 %v752_v2  ;;  %667 = vmatpush3.bf16.msra.mxu1 %v754_v6  ;;  %v768_v28 = vld [vmem:[#allocation4 + $0x80] sm:$0xff]   ;;  %v770_v30 = vld [vmem:[#allocation4 + $0xf0] sm:$0xff]   ;;  %v771_v31 = vld [vmem:[#allocation4 + $0xe8] sm:$0xff]  }
  0x2c   :  { %684 = vmatprep.subr.bf16.mxu0 %v854_v0  ;;  %668 = vmatprep.subr.bf16.mxu1 %v854_v0  ;;  %v772_v32 = vld [vmem:[#allocation4 + $0xe0] sm:$0xff]   ;;  %v773_v33 = vld [vmem:[#allocation4 + $0xd8] sm:$0xff]   ;;  %v774_v34 = vld [vmem:[#allocation4 + $0xd0] sm:$0xff]  }
  0x2d   :  { %v581_v35 = vld [vmem:[#allocation6 + $0x1] ss:$0 sm:$0xff]  ;;  %v775_v43 = vld [vmem:[#allocation4 + $0xc8] sm:$0xff]   ;;  %v777_v45 = vld [vmem:[#allocation4 + $0x138] sm:$0xff]  }
  0x2e   :  { %661 = vmatmul.mubr.msk.bf16.vlgmr.msra.gmra.mxu0 %vm75_vm1, %v53_v5  ;;  %v776_v44 = vld [vmem:[#allocation4 + $0xc0] sm:$0xff]   ;;  %v778_v46 = vld [vmem:[#allocation4 + $0x130] sm:$0xff]   ;;  %v779_v47 = vld [vmem:[#allocation4 + $0x128] sm:$0xff]  }
  0x2f   :  { %700 = vmatprep.mubr.msk.bf16.mxu0 %vm855_vm0, %v854_v0  ;;  %669 = vmatpush3.bf16.msra.mxu1 %v755_v7  ;;  %v780_v48 = vld [vmem:[#allocation4 + $0x120] sm:$0xff]   ;;  %v781_v49 = vld [vmem:[#allocation4 + $0x118] sm:$0xff]   ;;  %v782_v50 = vld [vmem:[#allocation4 + $0x110] sm:$0xff]  }
  0x30   :  { %670 = vmatprep.subr.bf16.mxu1 %v854_v0  ;;  %685 = vmatpush3.bf16.msra.mxu0 %v761_v13  ;;  %v590_v51 = vld [vmem:[#allocation6 + $0x2] ss:$0 sm:$0xff]  ;;  %v783_v59 = vld [vmem:[#allocation4 + $0x108] sm:$0xff]   ;;  %v599_v61 = vld [vmem:[#allocation6 + $0x3] ss:$0 sm:$0xff] }
  0x31   :  { %686 = vmatprep.subr.bf16.mxu0 %v854_v0  ;;  %v784_v60 = vld [vmem:[#allocation4 + $0x100] sm:$0xff]  }
  0x32   :  { %v608_v6 = vld [vmem:[#allocation6 + $0x4] ss:$0 sm:$0xff] }
  0x33   :  { %671 = vmatpush3.bf16.msra.mxu1 %v756_v8 }
  0x34   :  { %672 = vmatprep.subr.bf16.mxu1 %v854_v0  ;;  %687 = vmatpush3.bf16.msra.mxu0 %v762_v14 }
  0x35   :  { %688 = vmatprep.subr.bf16.mxu0 %v854_v0 }
  0x37   :  { %673 = vmatpush3.bf16.msra.mxu1 %v757_v9 }
  0x38   :  { %674 = vmatprep.subr.bf16.mxu1 %v854_v0  ;;  %689 = vmatpush3.bf16.msra.mxu0 %v763_v15 }
  0x39   :  { %690 = vmatprep.subr.bf16.mxu0 %v854_v0 }
  0x3b   :  { %675 = vmatpush3.bf16.msra.mxu1 %v758_v10 }
  0x3c   :  { %676 = vmatprep.subr.bf16.mxu1 %v854_v0  ;;  %691 = vmatpush3.bf16.msra.mxu0 %v764_v16 }
  0x3d   :  { %692 = vmatprep.subr.bf16.mxu0 %v854_v0 }
  0x3f   :  { %677 = vmatpush3.bf16.msra.mxu1 %v759_v11 }
  0x40   :  { %678 = vmatprep.subr.bf16.mxu1 %v854_v0  ;;  %693 = vmatpush3.bf16.msra.mxu0 %v765_v17 }
  0x41   :  { %694 = vmatprep.subr.bf16.mxu0 %v854_v0 }
  0x43   :  { %679 = vmatpush3.bf16.msra.mxu1 %v760_v12 }
  0x44   :  { %704 = vmatprep.subr.bf16.mxu1 %v854_v0  ;;  %695 = vmatpush3.bf16.msra.mxu0 %v766_v18 }
  0x45   :  { %696 = vmatprep.subr.bf16.mxu0 %v854_v0 }
  0x48   :  { %697 = vmatpush3.bf16.msra.mxu0 %v767_v27 }
  0x49   :  { %698 = vmatprep.subr.bf16.mxu0 %v854_v0 }
  0x4c   :  { %699 = vmatpush3.bf16.msra.mxu0 %v768_v28 }
  0x4d   :  { %724 = vmatprep.subr.bf16.mxu0 %v854_v0 }
  0xee   :  { %v113_v20 = vpop.f32.mrf.mxu0 }
  0xef   :  { %v114_v21 = vadd.f32 %v577_v19, %v113_v20 }
  0xf0   :  { %v662_v22 = vpop.f32.mrf.mxu0 }
  0xf1   :  { %v119_v23 = vmax.f32 %v114_v21, 0.0 }
  0xf2   :  { %v116_v24 = vpop.f32.mrf.mxu0 }
  0xf3   :  { %v120_v25 = vpack.c.bf16 %v119_v23, %v119_v23 }
  0xf4   :  { %v663_v26 = vpop.f32.mrf.mxu0 }
  0xf5   :  { %681 = vmatmul.mubr.bf16.vlgmr.msra.gmra.mxu1 %v120_v25 }
  0xf6   :  { %720 = vmatprep.mubr.msk.bf16.mxu1 %vm855_vm0, %v854_v0  ;;  %705 = vmatpush3.bf16.msra.mxu1 %v769_v29 }
  0xf7   :  { %706 = vmatprep.subr.bf16.mxu1 %v854_v0 }
  0xfa   :  { %707 = vmatpush3.bf16.msra.mxu1 %v770_v30 }
  0xfb   :  { %708 = vmatprep.subr.bf16.mxu1 %v854_v0 }
  0xfe   :  { %709 = vmatpush3.bf16.msra.mxu1 %v771_v31 }
  0xff   :  { %710 = vmatprep.subr.bf16.mxu1 %v854_v0 }
 0x102   :  { %711 = vmatpush3.bf16.msra.mxu1 %v772_v32 }
 0x103   :  { %712 = vmatprep.subr.bf16.mxu1 %v854_v0 }
 0x106   :  { %713 = vmatpush3.bf16.msra.mxu1 %v773_v33 }
 0x107   :  { %714 = vmatprep.subr.bf16.mxu1 %v854_v0 }
 0x10a   :  { %715 = vmatpush3.bf16.msra.mxu1 %v774_v34 }
 0x10b   :  { %716 = vmatprep.subr.bf16.mxu1 %v854_v0 }
 0x10e   :  { %717 = vmatpush3.bf16.msra.mxu1 %v775_v43 }
 0x10f   :  { %718 = vmatprep.subr.bf16.mxu1 %v854_v0 }
 0x112   :  { %719 = vmatpush3.bf16.msra.mxu1 %v776_v44 }
 0x1b5   :  { %v225_v36 = vpop.f32.mrf.mxu1 }
 0x1b6   :  { %v226_v37 = vadd.f32 %v581_v35, %v225_v36 }
 0x1b7   :  { %v682_v38 = vpop.f32.mrf.mxu1 }
 0x1b8   :  { %v231_v39 = vmax.f32 %v226_v37, 0.0 }
 0x1b9   :  { %v228_v40 = vpop.f32.mrf.mxu1 }
 0x1ba   :  { %v232_v41 = vpack.c.bf16 %v231_v39, %v231_v39 }
 0x1bb   :  { %v683_v42 = vpop.f32.mrf.mxu1 }
 0x1bc   :  { %701 = vmatmul.mubr.bf16.vlgmr.msra.gmra.mxu0 %v232_v41 }
 0x1bd   :  { %740 = vmatprep.mubr.msk.bf16.mxu0 %vm855_vm0, %v854_v0  ;;  %725 = vmatpush3.bf16.msra.mxu0 %v777_v45 }
 0x1be   :  { %726 = vmatprep.subr.bf16.mxu0 %v854_v0 }
 0x1c1   :  { %727 = vmatpush3.bf16.msra.mxu0 %v778_v46 }
 0x1c2   :  { %728 = vmatprep.subr.bf16.mxu0 %v854_v0 }
 0x1c5   :  { %729 = vmatpush3.bf16.msra.mxu0 %v779_v47 }
 0x1c6   :  { %730 = vmatprep.subr.bf16.mxu0 %v854_v0 }
 0x1c9   :  { %731 = vmatpush3.bf16.msra.mxu0 %v780_v48 }
 0x1ca   :  { %732 = vmatprep.subr.bf16.mxu0 %v854_v0 }
 0x1cd   :  { %733 = vmatpush3.bf16.msra.mxu0 %v781_v49 }
 0x1ce   :  { %734 = vmatprep.subr.bf16.mxu0 %v854_v0 }
 0x1d1   :  { %735 = vmatpush3.bf16.msra.mxu0 %v782_v50 }
 0x1d2   :  { %736 = vmatprep.subr.bf16.mxu0 %v854_v0 }
 0x1d5   :  { %737 = vmatpush3.bf16.msra.mxu0 %v783_v59 }
 0x1d6   :  { %738 = vmatprep.subr.bf16.mxu0 %v854_v0 }
 0x1d9   :  { %739 = vmatpush3.bf16.msra.mxu0 %v784_v60 }
 0x27c   :  { %v337_v52 = vpop.f32.mrf.mxu0 }
 0x27d   :  { %v338_v53 = vadd.f32 %v590_v51, %v337_v52 }
 0x27e   :  { %v702_v54 = vpop.f32.mrf.mxu0 }
 0x27f   :  { %v343_v55 = vmax.f32 %v338_v53, 0.0 }
 0x280   :  { %v340_v56 = vpop.f32.mrf.mxu0 }
 0x281   :  { %v344_v57 = vpack.c.bf16 %v343_v55, %v343_v55 }
 0x282   :  { %v703_v58 = vpop.f32.mrf.mxu0 }
 0x283   :  { %721 = vmatmul.mubr.bf16.vlgmr.msra.gmra.mxu1 %v344_v57 }
 0x343   :  { %v449_v62 = vpop.f32.mrf.mxu1 }
 0x344   :  { %v450_v63 = vadd.f32 %v599_v61, %v449_v62 }
 0x345   :  { %v722_v1 = vpop.f32.mrf.mxu1 }
 0x346   :  { %v455_v2 = vmax.f32 %v450_v63, 0.0 }
 0x347   :  { %v452_v3 = vpop.f32.mrf.mxu1 }
 0x348   :  { %v457_v4 = vpack.c.bf16 %v455_v2, %v455_v2  ;;  %v456_v10 = vadd.f32 %v455_v2, %v343_v55 }
 0x349   :  { %v723_v5 = vpop.f32.mrf.mxu1 }
 0x34a   :  { %741 = vmatmul.mubr.bf16.vlgmr.msra.gmra.mxu0 %v457_v4 }
 0x40a   :  { %v562_v7 = vpop.f32.mrf.mxu0 }
 0x40b   :  { %v563_v8 = vadd.f32 %v608_v6, %v562_v7 }
 0x40c   :  { %v742_v9 = vpop.f32.mrf.mxu0 }
 0x40d   :  { %v568_v11 = vmax.f32 %v563_v8, 0.0 }
 0x40e   :  { %v565_v12 = vpop.f32.mrf.mxu0 }
 0x40f   :  { %v569_v13 = vadd.f32 %v568_v11, %v456_v10 }
 0x410   :  { %v743_v0 = vpop.f32.mrf.mxu0 }
 0x411   :  { %570 = vst [vmem:[%s935_s3] sm:$0xff] %v569_v13 }
 0x412   :  { %575 = vsyncpa [#allocation3], 1 }
 0x413   :  { %576 = vsyncpa [#allocation5], 1 }

</bundles_post_ra>
